<compile_context>
chip_gen: v6e
topology: v6e:2x2x1
jax: 0.10.0
libtpu: 0.0.40
codegen_flags: <defaults>
</compile_context>

<pallas_src>
import functools

import jax
import jax.numpy as jnp
from jax import lax
from jax.experimental import pallas as pl
from jax.experimental.pallas import tpu as pltpu


def _round_up(x, m):
    return ((x + m - 1) // m) * m


def _pick_rows(n, desired):
    """Row-tile size / count: large tiles, minimal tail padding, and >= 2 tiles
    whenever possible so the 'parallel' row axis splits across v7x's two TCs."""
    desired = max(8, min(desired, _round_up(n, 8)))
    k = -(-n // desired)
    if n > 8:
        k = max(k, 2)
    return _round_up(-(-n // k), 8), k


def _footprint_bytes(row_tile, h_tile, resident, d_pad, xsz, wsz):
    """Approximate per-step VMEM footprint (pipeline buffers + scratch + f32 temps)."""
    wbuf = 1 if resident else 2            # Buffered(1) resident weights vs. streamed
    weights = wbuf * 2 * d_pad * h_tile * wsz + wbuf * (h_tile + d_pad) * 4
    acts = (2 * row_tile * d_pad * xsz     # x tile (double-buffered)
            + 2 * row_tile * d_pad * xsz   # out tile (double-buffered)
            + 2 * row_tile * h_tile * 4    # fc1 output / GELU f32 intermediates
            + 2 * row_tile * d_pad * 4)    # LN temps / fc2 f32 result
    if not resident:
        acts += row_tile * d_pad * (wsz + 4)   # xn scratch + f32 accumulator
    return weights + acts


def _ln_mlp_kernel(x_ref, w1_ref, b1_ref, w2_ref, b2_ref, o_ref,
                   xn_ref=None, acc_ref=None, *, d_true, d_pad, eps):
    """One (row_tile, D_pad) token tile x one hidden chunk.

    Grid = (row_tiles, hidden_chunks).  When the weights are VMEM-resident the hidden
    axis has a single chunk and xn_ref/acc_ref are not allocated (fast path).
    """
    inv_sqrt2 = jnp.float32(0.7071067811865476)

    def _normalized_f32():
        # LayerNorm stats over the true feature dim; gamma/beta are folded into w1/b1
        # by the wrapper, so only (x - mean) * rsqrt(var + eps) is needed here.
        x = x_ref[...].astype(jnp.float32)
        inv_d = jnp.float32(1.0 / d_true)
        mean = jnp.sum(x, axis=-1, keepdims=True) * inv_d
        xc = x - mean
        if d_true != d_pad:
            lane = lax.broadcasted_iota(jnp.int32, x.shape, 1)
            xc = jnp.where(lane < d_true, xc, 0.0)   # keep padded lanes out of stats
        inv_std = lax.rsqrt(jnp.sum(xc * xc, axis=-1, keepdims=True) * inv_d
                            + jnp.float32(eps))
        return xc * inv_std

    if xn_ref is None:
        # ---------- weight-resident fast path (single hidden chunk) ----------
        xn = _normalized_f32().astype(w1_ref.dtype)
        h = jnp.dot(xn, w1_ref[...], preferred_element_type=jnp.float32)
        h = h + b1_ref[...]
        # exact GELU (PyTorch nn.GELU default): 0.5*x*(1+erf(x/sqrt(2)))
        h = 0.5 * h * (1.0 + lax.erf(h * inv_sqrt2))
        # dropout -> identity (inference)
        out = jnp.dot(h.astype(w2_ref.dtype), w2_ref[...],
                      preferred_element_type=jnp.float32)
        o_ref[...] = (out + b2_ref[...]).astype(o_ref.dtype)
    else:
        # ---------- streamed-weight fallback (hidden axis tiled) ----------
        h_idx = pl.program_id(1)

        @pl.when(h_idx == 0)
        def _init():
            xn_ref[...] = _normalized_f32().astype(xn_ref.dtype)
            acc_ref[...] = jnp.zeros_like(acc_ref)

        h = jnp.dot(xn_ref[...], w1_ref[...], preferred_element_type=jnp.float32)
        h = h + b1_ref[...]
        h = 0.5 * h * (1.0 + lax.erf(h * inv_sqrt2))
        # dropout -> identity (inference)
        acc_ref[...] += jnp.dot(h.astype(w2_ref.dtype), w2_ref[...],
                                preferred_element_type=jnp.float32)

        @pl.when(h_idx == pl.num_programs(1) - 1)
        def _finish():
            o_ref[...] = (acc_ref[...] + b2_ref[...]).astype(o_ref.dtype)


@functools.partial(jax.jit, static_argnames=("eps", "mxu_dtype", "row_tile_max"))
def layer_normalize_mlp(x, gamma, beta, w1, b1, w2, b2, *,
                        eps=1e-5, mxu_dtype=jnp.bfloat16, row_tile_max=256):
    """LayerNormalize(dim, MLP_Block(dim, hidden)) forward, inference mode.

    x: (B, S, D); gamma/beta: (D,); w1: (D, H) (PyTorch fc1.weight.T); b1: (H,);
    w2: (H, D) (fc2.weight.T); b2: (D,).

    mxu_dtype: operand dtype for the two matmuls (accumulation is always f32).
    bf16 (default) runs the MXU at full rate on every generation; pass
    jnp.float32 to keep full f32 operands (~3-6x slower matmuls).
    """
    B, S, D = x.shape
    H = w1.shape[1]
    N = B * S

    D_pad = _round_up(D, 128)
    H_pad = _round_up(H, 128)

    xsz = jnp.dtype(x.dtype).itemsize
    wsz = jnp.dtype(mxu_dtype).itemsize

    # Generation-aware VMEM budget (v5e/v6e: 128 MiB/core, v7x: 64 MiB/core).
    try:
        vmem_cap = int(getattr(pltpu.get_tpu_info(), "vmem_capacity_bytes",
                               64 * 1024 * 1024))
    except Exception:
        vmem_cap = 64 * 1024 * 1024
    vmem_budget = int(0.8 * vmem_cap)

    # ---------------- tile selection (all trace-time Python) ----------------
    resident = False
    row_tile = k_rows = h_tile = 0
    # 1) preferred: weights fully VMEM-resident (DMA'd once for the whole call)
    for rt_des in (row_tile_max, 128, 64, 32, 16, 8):
        rt, k = _pick_rows(N, rt_des)
        if _footprint_bytes(rt, H_pad, True, D_pad, xsz, wsz) <= vmem_budget:
            row_tile, k_rows, h_tile, resident = rt, k, H_pad, True
            break
    if not resident:
        # 2) fallback: stream weights in hidden chunks; larger row tiles amortize
        #    the per-row-tile weight re-fetch from HBM.
        for rt_des in (max(2 * row_tile_max, 1024), row_tile_max, 128, 64, 32, 16, 8):
            rt, k = _pick_rows(N, rt_des)
            for ht in (2048, 1024, 512, 256, 128):
                if ht <= H_pad and _footprint_bytes(rt, ht, False, D_pad,
                                                    xsz, wsz) <= vmem_budget:
                    row_tile, k_rows, h_tile = rt, k, ht
                    break
            if row_tile:
                break
        if not row_tile:   # last resort: smallest tiles
            row_tile, k_rows = _pick_rows(N, 8)
            h_tile = 128

    H_pad_eff = _round_up(H_pad, h_tile)
    n_h = H_pad_eff // h_tile
    N_pad = row_tile * k_rows

    # Fold the LayerNorm affine into fc1 (in f32), then cast weights to mxu_dtype.
    gamma32 = gamma.astype(jnp.float32)
    beta32 = beta.astype(jnp.float32)
    w1_32 = w1.astype(jnp.float32)
    w1f = gamma32[:, None] * w1_32
    b1f = b1.astype(jnp.float32) + beta32 @ w1_32

    x2 = jnp.pad(x.reshape(N, D), ((0, N_pad - N), (0, D_pad - D)))
    w1p = jnp.pad(w1f, ((0, D_pad - D), (0, H_pad_eff - H))).astype(mxu_dtype)
    w2p = jnp.pad(w2.astype(jnp.float32),
                  ((0, H_pad_eff - H), (0, D_pad - D))).astype(mxu_dtype)
    b1p = jnp.pad(b1f, (0, H_pad_eff - H)).reshape(1, H_pad_eff)              # f32
    b2p = jnp.pad(b2.astype(jnp.float32), (0, D_pad - D)).reshape(1, D_pad)   # f32

    grid = (k_rows, n_h)

    # Resident weights never change block index -> single-buffer them.
    wmode = pl.Buffered(1) if resident else None

    def wspec(shape, imap):
        if wmode is not None:
            return pl.BlockSpec(shape, imap, pipeline_mode=wmode)
        return pl.BlockSpec(shape, imap)

    in_specs = [
        pl.BlockSpec((row_tile, D_pad), lambda i, h: (i, 0)),    # x tile
        wspec((D_pad, h_tile), lambda i, h: (0, h)),             # w1 (gamma folded in)
        wspec((1, h_tile), lambda i, h: (0, h)),                 # b1 (+ beta @ w1)
        wspec((h_tile, D_pad), lambda i, h: (h, 0)),             # w2
        wspec((1, D_pad), lambda i, h: (0, 0)),                  # b2
    ]
    out_spec = pl.BlockSpec((row_tile, D_pad), lambda i, h: (i, 0))

    scratch_shapes = []
    if not resident:
        scratch_shapes = [
            pltpu.VMEM((row_tile, D_pad), mxu_dtype),    # normalized x (reused over h)
            pltpu.VMEM((row_tile, D_pad), jnp.float32),  # fc2 accumulator
        ]

    # Cost estimate: the resident path reads the weights exactly once.
    weight_bytes = (1 if resident else k_rows) * 2 * D_pad * H_pad_eff * wsz
    cost = pl.CostEstimate(
        flops=int(4 * N_pad * D_pad * H_pad_eff + 12 * N_pad * D_pad
                  + 8 * N_pad * H_pad_eff),
        transcendentals=int(N_pad * H_pad_eff + N_pad),
        bytes_accessed=int(2 * N_pad * D_pad * xsz + weight_bytes
                           + 4 * (H_pad_eff + D_pad)),
    )

    kernel = functools.partial(_ln_mlp_kernel, d_true=D, d_pad=D_pad, eps=eps)

    out = pl.pallas_call(
        kernel,
        out_shape=jax.ShapeDtypeStruct((N_pad, D_pad), x.dtype),
        grid_spec=pltpu.PrefetchScalarGridSpec(
            num_scalar_prefetch=0,
            grid=grid,
            in_specs=in_specs,
            out_specs=out_spec,
            scratch_shapes=scratch_shapes,
        ),
        compiler_params=pltpu.CompilerParams(
            dimension_semantics=("parallel", "arbitrary"),
            vmem_limit_bytes=vmem_budget,
        ),
        cost_estimate=cost,
    )(x2, w1p, b1p, w2p, b2p)

    return out[:N, :D].reshape(B, S, D)


def _reference(x, gamma, beta, w1, b1, w2, b2, eps=1e-5):
    mean = jnp.mean(x, axis=-1, keepdims=True)
    var = jnp.mean((x - mean) ** 2, axis=-1, keepdims=True)
    xn = (x - mean) * lax.rsqrt(var + eps) * gamma + beta
    h = jnp.einsum("bsd,dh->bsh", xn, w1, precision=lax.Precision.HIGHEST) + b1
    h = 0.5 * h * (1.0 + lax.erf(h * 0.7071067811865476))
    return jnp.einsum("bsh,hd->bsd", h, w2, precision=lax.Precision.HIGHEST) + b2


if __name__ == "__main__":
    # Small shapes consistent with the module: batch=2, seq=8, dim=32, hidden=64.
    B, S, D, Hdim = 2, 8, 32, 64

    key = jax.random.PRNGKey(0)
    kx, kg, kb, k1, k2, k3, k4 = jax.random.split(key, 7)

    x = jax.random.normal(kx, (B, S, D), dtype=jnp.float32)

    # LayerNorm params (PyTorch init is ones/zeros; perturb for a meaningful test).
    gamma = 1.0 + 0.1 * jax.random.normal(kg, (D,), dtype=jnp.float32)
    beta = 0.1 * jax.random.normal(kb, (D,), dtype=jnp.float32)

    # MLP params (PyTorch-Linear-style uniform bounds), stored as (in, out).
    bound1 = 1.0 / (D ** 0.5)
    bound2 = 1.0 / (Hdim ** 0.5)
    w1 = jax.random.uniform(k1, (D, Hdim), jnp.float32, -bound1, bound1)
    b1 = jax.random.uniform(k2, (Hdim,), jnp.float32, -bound1, bound1)
    w2 = jax.random.uniform(k3, (Hdim, D), jnp.float32, -bound2, bound2)
    b2 = jax.random.uniform(k4, (D,), jnp.float32, -bound2, bound2)

    ref = _reference(x, gamma, beta, w1, b1, w2, b2)

    # Default path: bf16 MXU operands, f32 accumulation (fast path on all generations).
    out = jax.block_until_ready(layer_normalize_mlp(x, gamma, beta, w1, b1, w2, b2))
    assert out.shape == (B, S, D)
    assert jnp.allclose(out, ref, atol=3e-2, rtol=3e-2), "bf16-MXU path mismatch"

    # Full-f32 path: matches the PyTorch-style reference tightly.
    out_f32 = jax.block_until_ready(
        layer_normalize_mlp(x, gamma, beta, w1, b1, w2, b2, mxu_dtype=jnp.float32))
    assert jnp.allclose(out_f32, ref, atol=2e-5, rtol=2e-5), "f32 path mismatch"

    print("KERNEL_OK")
</pallas_src>

<mosaic_0001>
module attributes {stable_mosaic.version = 11 : i64} {
  func.func @_ln_mlp_kernel(%arg0: i32, %arg1: i32, %arg2: memref<8x128xf32, #tpu.memory_space<vmem>>, %arg3: memref<128x128xbf16, #tpu.memory_space<vmem>>, %arg4: memref<1x128xf32, #tpu.memory_space<vmem>>, %arg5: memref<128x128xbf16, #tpu.memory_space<vmem>>, %arg6: memref<1x128xf32, #tpu.memory_space<vmem>>, %arg7: memref<8x128xf32, #tpu.memory_space<vmem>>) attributes {dimension_semantics = [#tpu.dimension_semantics<parallel>, #tpu.dimension_semantics<arbitrary>], iteration_bounds = array<i64: 2, 1>, scalar_prefetch = 0 : i64, scratch_operands = 0 : i64, tpu.core_type = #tpu.core_type<tc>, window_params = [{transform_indices = @transform_0, window_bounds = array<i64: 8, 128>}, {pipeline_mode = #tpu.pipeline_mode<synchronous>, transform_indices = @transform_1, window_bounds = array<i64: 128, 128>}, {pipeline_mode = #tpu.pipeline_mode<synchronous>, transform_indices = @transform_2, window_bounds = array<i64: 1, 128>}, {pipeline_mode = #tpu.pipeline_mode<synchronous>, transform_indices = @transform_3, window_bounds = array<i64: 128, 128>}, {pipeline_mode = #tpu.pipeline_mode<synchronous>, transform_indices = @transform_4, window_bounds = array<i64: 1, 128>}, {transform_indices = @transform_5, window_bounds = array<i64: 8, 128>}]} {
    %c0 = arith.constant 0 : index
    %c0_0 = arith.constant 0 : index
    %0 = vector.load %arg2[%c0, %c0_0] : memref<8x128xf32, #tpu.memory_space<vmem>>, vector<8x128xf32>
    %cst = arith.constant dense<0.000000e+00> : vector<8xf32>
    %1 = vector.multi_reduction <add>, %0, %cst [1] : vector<8x128xf32> to vector<8xf32>
    %2 = vector.shape_cast %1 : vector<8xf32> to vector<8x1xf32>
    %cst_1 = arith.constant 3.125000e-02 : f32
    %3 = vector.broadcast %cst_1 : f32 to vector<8x1xf32>
    %4 = arith.mulf %2, %3 : vector<8x1xf32>
    %5 = vector.broadcast %4 : vector<8x1xf32> to vector<8x128xf32>
    %6 = arith.subf %0, %5 : vector<8x128xf32>
    %7 = tpu.iota {dimensions = array<i32: 1>} : vector<8x128xi32>
    %c32_i32 = arith.constant 32 : i32
    %8 = vector.broadcast %c32_i32 : i32 to vector<8x128xi32>
    %9 = arith.cmpi slt, %7, %8 : vector<8x128xi32>
    %cst_2 = arith.constant 0.000000e+00 : f32
    %10 = vector.broadcast %cst_2 : f32 to vector<8x128xf32>
    %11 = arith.select %9, %6, %10 : vector<8x128xi1>, vector<8x128xf32>
    %12 = arith.mulf %11, %11 : vector<8x128xf32>
    %cst_3 = arith.constant dense<0.000000e+00> : vector<8xf32>
    %13 = vector.multi_reduction <add>, %12, %cst_3 [1] : vector<8x128xf32> to vector<8xf32>
    %14 = vector.shape_cast %13 : vector<8xf32> to vector<8x1xf32>
    %cst_4 = arith.constant 3.125000e-02 : f32
    %15 = vector.broadcast %cst_4 : f32 to vector<8x1xf32>
    %16 = arith.mulf %14, %15 : vector<8x1xf32>
    %cst_5 = arith.constant 9.99999974E-6 : f32
    %17 = vector.broadcast %cst_5 : f32 to vector<8x1xf32>
    %18 = arith.addf %16, %17 : vector<8x1xf32>
    %19 = math.rsqrt %18 : vector<8x1xf32>
    %20 = vector.broadcast %19 : vector<8x1xf32> to vector<8x128xf32>
    %21 = arith.mulf %11, %20 : vector<8x128xf32>
    %22 = arith.truncf %21 : vector<8x128xf32> to vector<8x128xbf16>
    %c0_6 = arith.constant 0 : index
    %c0_7 = arith.constant 0 : index
    %23 = vector.load %arg3[%c0_6, %c0_7] : memref<128x128xbf16, #tpu.memory_space<vmem>>, vector<128x128xbf16>
    %cst_8 = arith.constant dense<0.000000e+00> : vector<8x128xf32>
    %24 = tpu.matmul %22, %23, %cst_8 {dimension_numbers = #tpu.dot_dimension_numbers<[1], [0], [0], [1], [0, 0, 1, 1], [], []>} : vector<8x128xbf16>, vector<128x128xbf16>, vector<8x128xf32> -> vector<8x128xf32>
    %c0_9 = arith.constant 0 : index
    %c0_10 = arith.constant 0 : index
    %25 = vector.load %arg4[%c0_9, %c0_10] : memref<1x128xf32, #tpu.memory_space<vmem>>, vector<1x128xf32>
    %26 = vector.broadcast %25 : vector<1x128xf32> to vector<8x128xf32>
    %27 = arith.addf %24, %26 : vector<8x128xf32>
    %cst_11 = arith.constant 5.000000e-01 : f32
    %28 = vector.broadcast %cst_11 : f32 to vector<8x128xf32>
    %29 = arith.mulf %28, %27 : vector<8x128xf32>
    %cst_12 = arith.constant 0.707106769 : f32
    %30 = vector.broadcast %cst_12 : f32 to vector<8x128xf32>
    %31 = arith.mulf %27, %30 : vector<8x128xf32>
    %32 = math.erf %31 : vector<8x128xf32>
    %cst_13 = arith.constant 1.000000e+00 : f32
    %33 = vector.broadcast %cst_13 : f32 to vector<8x128xf32>
    %34 = arith.addf %33, %32 : vector<8x128xf32>
    %35 = arith.mulf %29, %34 : vector<8x128xf32>
    %36 = arith.truncf %35 : vector<8x128xf32> to vector<8x128xbf16>
    %c0_14 = arith.constant 0 : index
    %c0_15 = arith.constant 0 : index
    %37 = vector.load %arg5[%c0_14, %c0_15] : memref<128x128xbf16, #tpu.memory_space<vmem>>, vector<128x128xbf16>
    %cst_16 = arith.constant dense<0.000000e+00> : vector<8x128xf32>
    %38 = tpu.matmul %36, %37, %cst_16 {dimension_numbers = #tpu.dot_dimension_numbers<[1], [0], [0], [1], [0, 0, 1, 1], [], []>} : vector<8x128xbf16>, vector<128x128xbf16>, vector<8x128xf32> -> vector<8x128xf32>
    %c0_17 = arith.constant 0 : index
    %c0_18 = arith.constant 0 : index
    %39 = vector.load %arg6[%c0_17, %c0_18] : memref<1x128xf32, #tpu.memory_space<vmem>>, vector<1x128xf32>
    %40 = vector.broadcast %39 : vector<1x128xf32> to vector<8x128xf32>
    %41 = arith.addf %38, %40 : vector<8x128xf32>
    %c0_19 = arith.constant 0 : index
    %c0_20 = arith.constant 0 : index
    %42 = vector.load %arg7[%c0_19, %c0_20] : memref<8x128xf32, #tpu.memory_space<vmem>>, vector<8x128xf32>
    tpu.vector_store %arg7[%c0_19, %c0_20], %41 {strides = array<i32>} : memref<8x128xf32, #tpu.memory_space<vmem>>, vector<8x128xf32>,
    return
  }
  func.func @transform_0(%arg0: i32, %arg1: i32) -> (i32, i32) {
    %c0_i32 = arith.constant 0 : i32
    %c0_i32_0 = arith.constant 0 : i32
    return %arg0, %c0_i32 : i32, i32
  }
  func.func @transform_1(%arg0: i32, %arg1: i32) -> (i32, i32) {
    %c0_i32 = arith.constant 0 : i32
    %c0_i32_0 = arith.constant 0 : i32
    return %c0_i32, %arg1 : i32, i32
  }
  func.func @transform_2(%arg0: i32, %arg1: i32) -> (i32, i32) {
    %c0_i32 = arith.constant 0 : i32
    %c0_i32_0 = arith.constant 0 : i32
    return %c0_i32, %arg1 : i32, i32
  }
  func.func @transform_3(%arg0: i32, %arg1: i32) -> (i32, i32) {
    %c0_i32 = arith.constant 0 : i32
    %c0_i32_0 = arith.constant 0 : i32
    return %arg1, %c0_i32 : i32, i32
  }
  func.func @transform_4(%arg0: i32, %arg1: i32) -> (i32, i32) {
    %c0_i32 = arith.constant 0 : i32
    %c0_i32_0 = arith.constant 0 : i32
    %c0_i32_1 = arith.constant 0 : i32
    return %c0_i32, %c0_i32_0 : i32, i32
  }
  func.func @transform_5(%arg0: i32, %arg1: i32) -> (i32, i32) {
    %c0_i32 = arith.constant 0 : i32
    %c0_i32_0 = arith.constant 0 : i32
    return %arg0, %c0_i32 : i32, i32
  }
}

</mosaic_0001>

<bundles_post_ra>
// kernel: layer_normalize_mlp.1
= control target key start
LH: loop header
LB: loop body
LE: loop exit
PB: predicated region body
PF: predicated region fallthrough
CT: control target
= control target key end

     0   :  { %s826_s18 = smov 0   ;;  %s828_s19 = smov 0   ;;  %s938_s0 = inlined_call_operand.vmem [shape: f32[16,128], index: 0, kind: input, shape index: {}]   ;;  %s939_s1 = inlined_call_operand.vmem [shape: bf16[128,128], index: 1, kind: input, shape index: {}]   ;;  %s940_s2 = inlined_call_operand.vmem [shape: f32[1,128], index: 2, kind: input, shape index: {}]   ;;  %s941_s3 = inlined_call_operand.vmem [shape: bf16[128,128], index: 3, kind: input, shape index: {}]   ;;  %s942_s4 = inlined_call_operand.vmem [shape: f32[1,128], index: 4, kind: input, shape index: {}]   ;;  %s943_s5 = inlined_call_operand.vmem [shape: f32[16,128], index: 5, kind: output, shape index: {}]  }
   0x1   :  { %s830_s20 = smov 0  }
   0x2 LB: > { %s27_s21 = sadd.s32 1, %s788_s19  ;;  %p643_p0 = scmp.ge.s32.totalorder %s792_s20, 1  ;;  %s792_s20 = sphi %s830_s20, %s15_s20   ;;  %s788_s19 = sphi %s828_s19, %s945_s19   ;;  %s784_s18 = sphi %s826_s18, %s944_s18  }
   0x3   : > { %p29_p1 = scmp.ge.s32.totalorder %s27_s21, 2  ;;  %p226_p2 = scmp.lt.s32.totalorder %s792_s20, 3 }
   0x5   : > { %s947_s21 = smov (%p29_p1, %s27_s21), 0  ;;  %p227_p3 = pnand %p643_p0, %p226_p2 }
   0x6   : > { %p264_p4 = scmp.lt.s32.totalorder (!%p227_p3), %s784_s18, 1 }
   0x7   : > { %230 = sbr.rel (%p227_p3) target bundleno = 737 (0x2e1), region = 40 }
   0xc   : > { %s949_s18 = smov (!%p264_p4, %s784_s18), 1  ;;  %v750_v1 = vld [vmem:[%s939_s1 + $0x38] sm:$0xff]   ;;  %v794_v2 = vmov 0.0   ;;  %v751_v3 = vld [vmem:[%s939_s1 + $0x30] sm:$0xff]   ;;  %v752_v4 = vld [vmem:[%s939_s1 + $0x28] sm:$0xff]   ;;  %v291_v5 = vlaneseq  ;;  %vm795_vm1 = vmmov 0  }
   0xd   : > { %s644_s22 = sshll.u32 %s949_s18, 3  ;;  %684 = vmatprep.subr.bf16.mxu0 %v794_v2  ;;  %704 = vmatprep.subr.bf16.mxu1 %v794_v2  ;;  %v753_v12 = vld [vmem:[%s939_s1 + $0x20] sm:$0xff]   ;;  %v754_v13 = vld [vmem:[%s939_s1 + $0x18] sm:$0xff]   ;;  %v755_v14 = vld [vmem:[%s939_s1 + $0x10] sm:$0xff]  }
   0xe   : > { %s267_s25 = scalar_lea.vmem %s938_s0, %s644_s22  ;;  %685 = vmatpush3.bf16.msra.mxu0 %v750_v1  ;;  %v292_v6 = vand.u32 127, %v291_v5  ;;  %700 = vmatprep.mubr.msk.bf16.mxu0 %vm795_vm1, %v794_v2  ;;  %v756_v15 = vld [vmem:[%s939_s1 + $0x8] sm:$0xff]   ;;  %v757_v16 = vld [vmem:[%s939_s1] sm:$0xff]   ;;  %v758_v17 = vld [vmem:[%s941_s3 + $0x38] sm:$0xff]   ;;  %s284_s24 = scalar_lea.vmem %s943_s5, %s644_s22 }
   0xf   : > { %v286_v0 = vld [vmem:[%s267_s25] sm:$0xff]  ;;  %686 = vmatprep.subr.bf16.mxu0 %v794_v2  ;;  %720 = vmatprep.mubr.msk.bf16.mxu1 %vm795_vm1, %v794_v2  ;;  %v759_v18 = vld [vmem:[%s941_s3 + $0x30] sm:$0xff]   ;;  %v760_v25 = vld [vmem:[%s941_s3 + $0x28] sm:$0xff]  }
  0x10   : > { %287 = vadd.xlane.f32.xlu0 %v286_v0  ;;  %vm293_vm0 = vcmp.lt.s32.totalorder %v292_v6, 32  ;;  %705 = vmatpush3.bf16.msra.mxu1 %v758_v17  ;;  %v761_v26 = vld [vmem:[%s941_s3 + $0x20] sm:$0xff]   ;;  %v762_v27 = vld [vmem:[%s941_s3 + $0x18] sm:$0xff]   ;;  %v763_v28 = vld [vmem:[%s941_s3 + $0x10] sm:$0xff]  }
  0x11   : > { %706 = vmatprep.subr.bf16.mxu1 %v794_v2  ;;  %v764_v29 = vld [vmem:[%s941_s3 + $0x8] sm:$0xff]   ;;  %v765_v30 = vld [vmem:[%s941_s3] sm:$0xff]  }
  0x12   : > { %687 = vmatpush3.bf16.msra.mxu0 %v751_v3  ;;  %v646_v31 = vld [vmem:[%s940_s2] ss:$0 sm:$0xff] }
  0x13   : > { %688 = vmatprep.subr.bf16.mxu0 %v794_v2  ;;  %v655_v43 = vld [vmem:[%s942_s4] ss:$0 sm:$0xff] }
  0x14   : > { %707 = vmatpush3.bf16.msra.mxu1 %v759_v18 }
  0x15   : > { %708 = vmatprep.subr.bf16.mxu1 %v794_v2 }
  0x16   : > { %689 = vmatpush3.bf16.msra.mxu0 %v752_v4 }
  0x17   : > { %690 = vmatprep.subr.bf16.mxu0 %v794_v2 }
  0x18   : > { %709 = vmatpush3.bf16.msra.mxu1 %v760_v25 }
  0x19   : > { %710 = vmatprep.subr.bf16.mxu1 %v794_v2 }
  0x1a   : > { %691 = vmatpush3.bf16.msra.mxu0 %v753_v12 }
  0x1b   : > { %692 = vmatprep.subr.bf16.mxu0 %v794_v2 }
  0x1c   : > { %711 = vmatpush3.bf16.msra.mxu1 %v761_v26 }
  0x1d   : > { %712 = vmatprep.subr.bf16.mxu1 %v794_v2 }
  0x1e   : > { %693 = vmatpush3.bf16.msra.mxu0 %v754_v13 }
  0x1f   : > { %694 = vmatprep.subr.bf16.mxu0 %v794_v2 }
  0x20   : > { %713 = vmatpush3.bf16.msra.mxu1 %v762_v27 }
  0x21   : > { %714 = vmatprep.subr.bf16.mxu1 %v794_v2 }
  0x22   : > { %695 = vmatpush3.bf16.msra.mxu0 %v755_v14 }
  0x23   : > { %696 = vmatprep.subr.bf16.mxu0 %v794_v2 }
  0x24   : > { %715 = vmatpush3.bf16.msra.mxu1 %v763_v28 }
  0x25   : > { %716 = vmatprep.subr.bf16.mxu1 %v794_v2 }
  0x26   : > { %697 = vmatpush3.bf16.msra.mxu0 %v756_v15 }
  0x27   : > { %698 = vmatprep.subr.bf16.mxu0 %v794_v2 }
  0x28   : > { %717 = vmatpush3.bf16.msra.mxu1 %v764_v29 }
  0x29   : > { %718 = vmatprep.subr.bf16.mxu1 %v794_v2 }
  0x2a   : > { %699 = vmatpush3.bf16.msra.mxu0 %v757_v16 }
  0x2c   : > { %719 = vmatpush3.bf16.msra.mxu1 %v765_v30 }
  0x99   : > { %v288_v7 = vpop.xlane.xlu0 %287 }
  0x9a   : > { %v289_v8 = vmul.f32 0.03125, %v288_v7 }
  0x9c   : > { %v290_v9 = vsub.f32 %v286_v0, %v289_v8 }
  0x9e   : > { %v294_v10 = vsel %vm293_vm0, %v290_v9, 0.0 }
  0x9f   : > { %v295_v11 = vmul.f32 %v294_v10, %v294_v10 }
  0xa1   : > { %296 = vadd.xlane.f32.xlu0 %v295_v11 }
 0x12a   : > { %v297_v19 = vpop.xlane.xlu0 %296 }
 0x12b   : > { %v298_v20 = vmul.f32 0.03125, %v297_v19 }
 0x12d   : > { %v299_v21 = vadd.f32 1e-05, %v298_v20 }
 0x12f   : > { %766 = vrsqrt.f32 %v299_v21 }
 0x13c   : > { %v767_v22 = vpop.eup %766 }
 0x13d   : > { %v301_v23 = vmul.f32 %v767_v22, %v294_v10 }
 0x13f   : > { %v302_v24 = vpack.c.bf16 %v301_v23, %v301_v23 }
 0x141   : > { %701 = vmatmul.mubr.bf16.vlgmr.msra.gmra.mxu0 %v302_v24 }
 0x201   : > { %v408_v32 = vpop.f32.mrf.mxu0 }
 0x202   : > { %v409_v33 = vadd.f32 %v646_v31, %v408_v32 }
 0x203   : > { %v702_v34 = vpop.f32.mrf.mxu0 }
 0x204   : > { %v415_v35 = vmul.f32 0.70710677, %v409_v33  ;;  %v414_v39 = vmul.f32 0.5, %v409_v33 }
 0x205   : > { %v411_v36 = vpop.f32.mrf.mxu0 }
 0x206   : > { %768 = verf.f32 %v415_v35 }
 0x207   : > { %v703_v37 = vpop.f32.mrf.mxu0 }
 0x213   : > { %v769_v38 = vpop.eup %768 }
 0x214   : > { %v417_v40 = vadd.f32 1.0, %v769_v38 }
 0x216   : > { %v418_v41 = vmul.f32 %v417_v40, %v414_v39 }
 0x218   : > { %v419_v42 = vpack.c.bf16 %v418_v41, %v418_v41 }
 0x21a   : > { %721 = vmatmul.mubr.bf16.vlgmr.msra.gmra.mxu1 %v419_v42 }
 0x2da   : > { %v525_v44 = vpop.f32.mrf.mxu1 }
 0x2db   : > { %v526_v45 = vadd.f32 %v655_v43, %v525_v44 }
 0x2dc   : > { %v722_v46 = vpop.f32.mrf.mxu1 }
 0x2dd   : > { %531 = vst [vmem:[%s284_s24] sm:$0xff] %v526_v45 }
 0x2de   : > { %v528_v47 = vpop.f32.mrf.mxu1 }
 0x2e0   : > { %v723_v48 = vpop.f32.mrf.mxu1 }
 0x2e1 PF: > { %s15_s20 = sadd.s32 1, %s792_s20   ;;  %s944_s18 = smov %s788_s19 }
 0x2e2   : > { %p12_p5 = scmp.ge.s32.totalorder %s15_s20, 4   ;;  %s945_s19 = smov %s947_s21 }
 0x2e4   :  { %14 = sbr.rel (!%p12_p5) target bundleno = 2 (0x2), region = 79 }

</bundles_post_ra>
